<compile_context>
chip_gen: v7x
topology: tpu7x:2x2x1
jax: 0.10.0
libtpu: 0.0.40
codegen_flags: <defaults>
</compile_context>

<pallas_src>
import jax
import jax.numpy as jnp
from jax.experimental import pallas as pl
from jax.experimental.pallas import tpu as pltpu


def _nn_kernel(x_ref, w_ref, b_ref, o_ref):
    # x_ref: (tb, D), w_ref: (D, l_pad), b_ref: (1, l_pad), o_ref: (tb, l_pad)
    y = jnp.dot(x_ref[...], w_ref[...], preferred_element_type=jnp.float32)
    o_ref[...] = (y + b_ref[...]).astype(o_ref.dtype)


def _vmem_plan(B, D, l_pad):
    """Pick the batch tile (tb) from a VMEM budget and an explicit VMEM limit."""
    f32 = 4
    # Worst-case resident bytes (weight + bias); assume double-buffered so the
    # plan stays valid on the non-Buffered(1) fallback path too.
    resident = 2 * f32 * l_pad * (D + 1)
    # Per batch-row bytes in flight: double-buffered x tile + out tile.
    per_row = 2 * f32 * (D + l_pad)
    budget = 24 * 1024 * 1024
    tb = (budget - resident) // per_row
    tb = max(8, min(1024, int(tb)))
    tb = min(tb, ((B + 7) // 8) * 8)   # no point tiling past the (rounded-up) batch
    tb = max(8, (tb // 8) * 8)
    vmem_limit = max(32 * 1024 * 1024, resident + tb * per_row + (4 << 20))
    # NOTE: for very large D (weight block a big fraction of v7x's 64 MiB VMEM,
    # D >= ~32k) a K-reduction grid axis would be the right fix instead of
    # shrinking tb; not needed at these model sizes.
    return tb, int(vmem_limit)


def _nn_forward(x, w_t, b_p, num_labels, *, optimized=True):
    """x: (B, S, D) f32, w_t: (D, l_pad) f32, b_p: (1, l_pad) f32 -> (B, num_labels)."""
    B, S, D = x.shape
    l_pad = w_t.shape[1]
    tb, vmem_limit = _vmem_plan(B, D, l_pad)

    if optimized and D >= 128:
        # Last-timestep select folded into the pipeline DMA: each grid step
        # reads tb rows of D*4 contiguous bytes (stride S*D*4) straight from
        # the original (B, S, D) buffer. Kernel sees (tb, D).
        x_in = x
        x_spec = pl.BlockSpec((tb, None, D), lambda i: (i, S - 1, 0))
    else:
        # Tiny D: per-row strided chunks are too small for an efficient DMA;
        # do the select with one cheap XLA strided slice instead.
        x_in = x[:, -1, :]
        x_spec = pl.BlockSpec((tb, D), lambda i: (i, 0))

    # Weight / bias: constant index maps -> DMA'd once, resident in VMEM.
    if optimized:
        resident_kw = dict(pipeline_mode=pl.Buffered(1))  # single buffer: halves footprint
    else:
        resident_kw = {}
    w_spec = pl.BlockSpec((D, l_pad), lambda i: (0, 0), **resident_kw)
    b_spec = pl.BlockSpec((1, l_pad), lambda i: (0, 0), **resident_kw)

    out = pl.pallas_call(
        _nn_kernel,
        out_shape=jax.ShapeDtypeStruct((B, l_pad), jnp.float32),
        grid_spec=pltpu.PrefetchScalarGridSpec(
            num_scalar_prefetch=0,
            grid=(pl.cdiv(B, tb),),               # ragged last tile: OOB writes are masked
            in_specs=[x_spec, w_spec, b_spec],
            out_specs=pl.BlockSpec((tb, l_pad), lambda i: (i, 0)),
        ),
        compiler_params=pltpu.CompilerParams(
            dimension_semantics=("parallel",),    # 2x on v7x's two TCs; serial loop on v5e/v6e
            vmem_limit_bytes=vmem_limit,
        ),
    )(x_in, w_t, b_p)

    # Padded label lanes are exact zeros (zero weight columns/bias); slice off.
    return out[:, :num_labels]


class NNPallas:
    """Pallas port of the PyTorch `NN` module: Linear over the last timestep."""

    def __init__(self, weight, bias):
        # weight: (L, D) (PyTorch Linear layout), bias: (L,)
        L, D = weight.shape
        self.num_labels = L
        self.input_size = D
        self.l_pad = ((L + 127) // 128) * 128
        # One-time prep (hoisted out of the per-call path): pre-transposed,
        # zero lane-padded weight (D, l_pad) and bias (1, l_pad).
        w_t = jnp.zeros((D, self.l_pad), jnp.float32).at[:, :L].set(
            weight.T.astype(jnp.float32))
        b_p = jnp.zeros((1, self.l_pad), jnp.float32).at[:, :L].set(
            bias.reshape(1, L).astype(jnp.float32))
        self.w_t = jax.device_put(w_t)
        self.b_p = jax.device_put(b_p)
        self._optimized = None  # resolved on first call

    def __call__(self, x):
        if self._optimized is not False:
            try:
                out = _nn_forward(x, self.w_t, self.b_p, self.num_labels,
                                  optimized=True)
                out = jax.block_until_ready(out)  # surface async failures inside the try
                self._optimized = True
                return out
            except Exception:
                # pl.Buffered(1) / squeezed-dim BlockSpec unsupported on this
                # jax version -> fall back to the proven baseline config.
                self._optimized = False
        return _nn_forward(x, self.w_t, self.b_p, self.num_labels, optimized=False)


if __name__ == "__main__":
    key = jax.random.PRNGKey(0)

    def make_case(B, S, D, L, k):
        kx, kw, kb = jax.random.split(k, 3)
        x = jax.random.normal(kx, (B, S, D), dtype=jnp.float32)
        bound = 1.0 / float(D) ** 0.5
        w = jax.random.uniform(kw, (L, D), minval=-bound, maxval=bound,
                               dtype=jnp.float32)
        b = jax.random.uniform(kb, (L,), minval=-bound, maxval=bound,
                               dtype=jnp.float32)
        return x, w, b

    k1, k2 = jax.random.split(key)

    # Case 1: module-consistent small shapes (batch=2, seq=8, input_size=32, num_labels=4).
    x, w, b = make_case(2, 8, 32, 4, k1)
    model = NNPallas(w, b)
    out = jax.block_until_ready(model(x))
    ref = x[:, -1, :] @ w.T + b
    assert out.shape == ref.shape
    assert jnp.allclose(out, ref, atol=1e-5, rtol=1e-5)

    # Case 2: D >= 128 exercises the in-kernel last-timestep select (BlockSpec
    # index_map on the sequence axis) and a ragged batch tile.
    x2, w2, b2 = make_case(4, 8, 256, 10, k2)
    model2 = NNPallas(w2, b2)
    out2 = jax.block_until_ready(model2(x2))
    ref2 = x2[:, -1, :] @ w2.T + b2
    assert out2.shape == ref2.shape
    assert jnp.allclose(out2, ref2, atol=5e-3, rtol=5e-3)

    print("KERNEL_OK")
</pallas_src>

<mosaic_0001>
module attributes {stable_mosaic.version = 11 : i64} {
  func.func @_nn_kernel(%arg0: i32, %arg1: memref<8x32xf32, #tpu.memory_space<vmem>>, %arg2: memref<32x128xf32, #tpu.memory_space<vmem>>, %arg3: memref<1x128xf32, #tpu.memory_space<vmem>>, %arg4: memref<8x128xf32, #tpu.memory_space<vmem>>) attributes {dimension_semantics = [#tpu.dimension_semantics<parallel>], iteration_bounds = array<i64: 1>, scalar_prefetch = 0 : i64, scratch_operands = 0 : i64, tpu.core_type = #tpu.core_type<tc>, window_params = [{transform_indices = @transform_0, window_bounds = array<i64: 8, 32>}, {pipeline_mode = #tpu.pipeline_mode<synchronous>, transform_indices = @transform_1, window_bounds = array<i64: 32, 128>}, {pipeline_mode = #tpu.pipeline_mode<synchronous>, transform_indices = @transform_2, window_bounds = array<i64: 1, 128>}, {transform_indices = @transform_3, window_bounds = array<i64: 8, 128>}]} {
    %c0 = arith.constant 0 : index
    %c0_0 = arith.constant 0 : index
    %0 = vector.load %arg1[%c0, %c0_0] : memref<8x32xf32, #tpu.memory_space<vmem>>, vector<8x32xf32>
    %c0_1 = arith.constant 0 : index
    %c0_2 = arith.constant 0 : index
    %1 = vector.load %arg2[%c0_1, %c0_2] : memref<32x128xf32, #tpu.memory_space<vmem>>, vector<32x128xf32>
    %cst = arith.constant dense<0.000000e+00> : vector<8x128xf32>
    %2 = tpu.matmul %0, %1, %cst {dimension_numbers = #tpu.dot_dimension_numbers<[1], [0], [0], [1], [0, 0, 1, 1], [], []>} : vector<8x32xf32>, vector<32x128xf32>, vector<8x128xf32> -> vector<8x128xf32>
    %c0_3 = arith.constant 0 : index
    %c0_4 = arith.constant 0 : index
    %3 = vector.load %arg3[%c0_3, %c0_4] : memref<1x128xf32, #tpu.memory_space<vmem>>, vector<1x128xf32>
    %4 = vector.broadcast %3 : vector<1x128xf32> to vector<8x128xf32>
    %5 = arith.addf %2, %4 : vector<8x128xf32>
    %c0_5 = arith.constant 0 : index
    %c0_6 = arith.constant 0 : index
    %6 = vector.load %arg4[%c0_5, %c0_6] : memref<8x128xf32, #tpu.memory_space<vmem>>, vector<8x128xf32>
    tpu.vector_store %arg4[%c0_5, %c0_6], %5 {strides = array<i32>} : memref<8x128xf32, #tpu.memory_space<vmem>>, vector<8x128xf32>,
    return
  }
  func.func @transform_0(%arg0: i32) -> (i32, i32) {
    %c0_i32 = arith.constant 0 : i32
    %c0_i32_0 = arith.constant 0 : i32
    return %arg0, %c0_i32 : i32, i32
  }
  func.func @transform_1(%arg0: i32) -> (i32, i32) {
    %c0_i32 = arith.constant 0 : i32
    %c0_i32_0 = arith.constant 0 : i32
    %c0_i32_1 = arith.constant 0 : i32
    return %c0_i32, %c0_i32_0 : i32, i32
  }
  func.func @transform_2(%arg0: i32) -> (i32, i32) {
    %c0_i32 = arith.constant 0 : i32
    %c0_i32_0 = arith.constant 0 : i32
    %c0_i32_1 = arith.constant 0 : i32
    return %c0_i32, %c0_i32_0 : i32, i32
  }
  func.func @transform_3(%arg0: i32) -> (i32, i32) {
    %c0_i32 = arith.constant 0 : i32
    %c0_i32_0 = arith.constant 0 : i32
    return %arg0, %c0_i32 : i32, i32
  }
}

module attributes {stable_mosaic.version = 11 : i64} {
  func.func @_nn_kernel(%arg0: i32, %arg1: memref<8x32xf32, #tpu.memory_space<vmem>>, %arg2: memref<32x128xf32, #tpu.memory_space<vmem>>, %arg3: memref<1x128xf32, #tpu.memory_space<vmem>>, %arg4: memref<8x128xf32, #tpu.memory_space<vmem>>) attributes {dimension_semantics = [#tpu.dimension_semantics<parallel>], iteration_bounds = array<i64: 1>, scalar_prefetch = 0 : i64, scratch_operands = 0 : i64, tpu.core_type = #tpu.core_type<tc>, window_params = [{transform_indices = @transform_0, window_bounds = array<i64: 8, 32>}, {pipeline_mode = #tpu.pipeline_mode<synchronous>, transform_indices = @transform_1, window_bounds = array<i64: 32, 128>}, {pipeline_mode = #tpu.pipeline_mode<synchronous>, transform_indices = @transform_2, window_bounds = array<i64: 1, 128>}, {transform_indices = @transform_3, window_bounds = array<i64: 8, 128>}]} {
    %c0 = arith.constant 0 : index
    %c0_0 = arith.constant 0 : index
    %0 = vector.load %arg1[%c0, %c0_0] : memref<8x32xf32, #tpu.memory_space<vmem>>, vector<8x32xf32>
    %c0_1 = arith.constant 0 : index
    %c0_2 = arith.constant 0 : index
    %1 = vector.load %arg2[%c0_1, %c0_2] : memref<32x128xf32, #tpu.memory_space<vmem>>, vector<32x128xf32>
    %cst = arith.constant dense<0.000000e+00> : vector<8x128xf32>
    %2 = tpu.matmul %0, %1, %cst {dimension_numbers = #tpu.dot_dimension_numbers<[1], [0], [0], [1], [0, 0, 1, 1], [], []>} : vector<8x32xf32>, vector<32x128xf32>, vector<8x128xf32> -> vector<8x128xf32>
    %c0_3 = arith.constant 0 : index
    %c0_4 = arith.constant 0 : index
    %3 = vector.load %arg3[%c0_3, %c0_4] : memref<1x128xf32, #tpu.memory_space<vmem>>, vector<1x128xf32>
    %4 = vector.broadcast %3 : vector<1x128xf32> to vector<8x128xf32>
    %5 = arith.addf %2, %4 : vector<8x128xf32>
    %c0_5 = arith.constant 0 : index
    %c0_6 = arith.constant 0 : index
    %6 = vector.load %arg4[%c0_5, %c0_6] : memref<8x128xf32, #tpu.memory_space<vmem>>, vector<8x128xf32>
    tpu.vector_store %arg4[%c0_5, %c0_6], %5 {strides = array<i32>} : memref<8x128xf32, #tpu.memory_space<vmem>>, vector<8x128xf32>,
    return
  }
  func.func @transform_0(%arg0: i32) -> (i32, i32) {
    %c0_i32 = arith.constant 0 : i32
    %c0_i32_0 = arith.constant 0 : i32
    return %arg0, %c0_i32 : i32, i32
  }
  func.func @transform_1(%arg0: i32) -> (i32, i32) {
    %c0_i32 = arith.constant 0 : i32
    %c0_i32_0 = arith.constant 0 : i32
    %c0_i32_1 = arith.constant 0 : i32
    return %c0_i32, %c0_i32_0 : i32, i32
  }
  func.func @transform_2(%arg0: i32) -> (i32, i32) {
    %c0_i32 = arith.constant 0 : i32
    %c0_i32_0 = arith.constant 0 : i32
    %c0_i32_1 = arith.constant 0 : i32
    return %c0_i32, %c0_i32_0 : i32, i32
  }
  func.func @transform_3(%arg0: i32) -> (i32, i32) {
    %c0_i32 = arith.constant 0 : i32
    %c0_i32_0 = arith.constant 0 : i32
    return %arg0, %c0_i32 : i32, i32
  }
}

</mosaic_0001>

<bundles_post_ra>
// kernel: tpu_custom_call.1
= control target key start
LH: loop header
LB: loop body
LE: loop exit
PB: predicated region body
PF: predicated region fallthrough
CT: control target
= control target key end

     0   :  { %8 = vsyncpa [#allocation3], 0  ;;  %s329_s0 = inlined_call_operand.hbm [shape: f32[2,32], index: 0, kind: input, shape index: {}]   ;;  %s330_s1 = inlined_call_operand.hbm [shape: f32[32,128], index: 1, kind: input, shape index: {}]   ;;  %s331_s2 = inlined_call_operand.vmem [shape: f32[1,128], index: 2, kind: input, shape index: {}]   ;;  %s332_s3 = inlined_call_operand.hbm [shape: f32[2,128], index: 3, kind: output, shape index: {}]  }
   0x1   :  { %9 = vsyncpa [#allocation6], 0 }
   0x2   :  { %10 = vsyncpa [#allocation4], 0 }
   0x3   :  { %15 = vsyncadd [#allocation3], 96  ;;  %s254_s12 = smov [#allocation2]   ;;  %s182_s16 = scalar_lea.hbm %s329_s0, 32 }
   0x4   :  { %s16_s13 = sshll.u32 %s254_s12, 4  ;;  %p183_p0 = scmp.ne.s32.totalorder %s329_s0, %s182_s16  ;;  %s17_s13 = int_to_ptr.vmem [resolvable:$true] %s16_s13 }
   0x5   :  { %p186_p1 = scmp.lt.u32.totalorder %s182_s16, %s329_s0 }
   0x7   :  { %p188_p2 = pnand %p186_p1, %p183_p0 }
   0x9   :  { %191 = shalt.err (!%p188_p2)
}
   0xa   :  { %s192_s21 = scalar_lea.vmem %s17_s13, 32  ;;  %s196_s22 = scalar_lea.vmem %s17_s13, 128 }
   0xb   :  { %p193_p3 = scmp.ne.s32.totalorder %s17_s13, %s192_s21  ;;  %p197_p4 = scmp.lt.s32.totalorder %s17_s13, %s17_s13 }
   0xc   :  { %p198_p5 = scmp.lt.s32.totalorder %s196_s22, %s192_s21 }
   0xe   :  { %p199_p6 = por %p198_p5, %p197_p4 }
  0x10   :  { %p200_p7 = pnand %p199_p6, %p193_p3 }
  0x12   :  { %203 = shalt.err (!%p200_p7)
}
  0x13   :  { %s255_s23 = smov 32   ;;  %s256_s24 = smov 2  }
  0x14   :  { %22 = dma.hbm_to_vmem [thread:$0]  %s329_s0, 32, %s17_s13, [#allocation3], %s255_s23, %s255_s23, %s256_s24  }
  0x15   :  { %s257_s27 = smov [#allocation5]   ;;  %s204_s4 = scalar_lea.hbm %s330_s1, 512 }
  0x16   :  { %s28_s28 = sshll.u32 %s257_s27, 4  ;;  %p205_p8 = scmp.ne.s32.totalorder %s330_s1, %s204_s4  ;;  %s29_s28 = int_to_ptr.vmem [resolvable:$true] %s28_s28 }
  0x17   :  { %p208_p9 = scmp.lt.u32.totalorder %s204_s4, %s330_s1 }
  0x19   :  { %p210_p10 = pnand %p208_p9, %p205_p8 }
  0x1b   :  { %213 = shalt.err (!%p210_p10)
}
  0x1c   :  { %s214_s9 = scalar_lea.vmem %s29_s28, 512  ;;  %p219_p12 = scmp.lt.s32.totalorder %s29_s28, %s29_s28 }
  0x1d   :  { %p215_p11 = scmp.ne.s32.totalorder %s29_s28, %s214_s9  ;;  %p220_p13 = scmp.lt.s32.totalorder %s214_s9, %s214_s9 }
  0x1f   :  { %p221_p0 = por %p220_p13, %p219_p12 }
  0x21   :  { %p222_p1 = pnand %p221_p0, %p215_p11 }
  0x23   :  { %225 = shalt.err (!%p222_p1)
}
  0x24   :  { %s258_s0 = smov 128   ;;  %s259_s10 = smov 8  }
  0x25   :  { %34 = dma.hbm_to_vmem [thread:$0]  %s330_s1, 512, %s29_s28, [#allocation6], %s258_s0, %s258_s0, %s259_s10  }
  0x26   :  { %248 = dma.done.wait [#allocation3], 128  }
  0x27   :  { %249 = vsyncadd [#allocation3], 4294967168 }
  0x28   :  { %250 = dma.done.wait [#allocation6], 512  }
  0x29   :  { %251 = vsyncadd [#allocation6], 4294966784  ;;  %v260_v0 = vmov 0.0|0.0   ;;  %vm261_vm0 = vmmov 0   ;;  %v262_v1 = vmov 0.0   ;;  %v44_v2 = vld [vmem:[#allocation5] sm:$0xff] }
  0x2a   :  { %166 = vmatprep.subr.bf16.mxu0 %v260_v0  ;;  %163 = vmatprep.mubr.msk.f32.mxu0 %vm261_vm0, %v262_v1  ;;  %v45_v3 = vld [vmem:[#allocation5 + $0x8] sm:$0xff]  ;;  %v46_v4 = vld [vmem:[#allocation5 + $0x10] sm:$0xff]  ;;  %v47_v6 = vld [vmem:[#allocation5 + $0x18] sm:$0xff]  ;;  %vm55_vm1 = vcmask 261120  }
  0x2b   :  { %v167_v5 = vpack.c.bf16 %v45_v3, %v44_v2  ;;  %v170_v7 = vpack.c.bf16 %v47_v6, %v46_v4  ;;  %v43_v8 = vld [vmem:[#allocation2] sm:$0xff] }
  0x2c   :  { %v148_v9 = vld [vmem:[%s331_s2] ss:$0 sm:$0xff] }
  0x2d   :  { %168 = vmatpush3.bf16.msra.mxu0 %v167_v5 }
  0x2e   :  { %169 = vmatprep.subr.bf16.mxu0 %v260_v0 }
  0x31   :  { %171 = vmatpush3.bf16.msra.mxu0 %v170_v7 }
  0x34   :  { %164 = vmatmul.mubr.msk.f32.vlgmr.msra.gmra.mrb[0].mxu0 %vm55_vm1, %v43_v8 }
 0x107   :  { %v125_v10 = vpop.f32.mrb[0].mxu0 }
 0x108   :  { %v126_v11 = vadd.f32 %v148_v9, %v125_v10  ;;  %v165_v12 = vpop.f32.mrb[1].mxu0 }
 0x10a   :  { %129 = vst [vmem:[#allocation7] sm:$0xff] %v126_v11 }
 0x10b   :  { %134 = vsyncadd [#allocation4], 96  ;;  %s263_s14 = smov [#allocation7]  }
 0x10c   :  { %s135_s15 = sshll.u32 %s263_s14, 4  ;;  %s136_s15 = int_to_ptr.vmem [resolvable:$true] %s135_s15 }
 0x10d   :  { %s226_s16 = scalar_lea.vmem %s136_s15, 32  ;;  %s230_s17 = scalar_lea.vmem %s136_s15, 128 }
 0x10e   :  { %p227_p2 = scmp.ne.s32.totalorder %s136_s15, %s226_s16  ;;  %p231_p3 = scmp.lt.s32.totalorder %s136_s15, %s136_s15 }
 0x10f   :  { %p232_p4 = scmp.lt.s32.totalorder %s230_s17, %s226_s16 }
 0x111   :  { %p233_p5 = por %p232_p4, %p231_p3 }
 0x113   :  { %p234_p6 = pnand %p233_p5, %p227_p2 }
 0x115   :  { %237 = shalt.err (!%p234_p6)
}
 0x116   :  { %s238_s2 = scalar_lea.hbm %s332_s3, 32 }
 0x117   :  { %p239_p7 = scmp.ne.s32.totalorder %s332_s3, %s238_s2  ;;  %p242_p8 = scmp.lt.u32.totalorder %s238_s2, %s332_s3 }
 0x119   :  { %p244_p9 = pnand %p242_p8, %p239_p7 }
 0x11b   :  { %247 = shalt.err (!%p244_p9)
}
 0x11c   :  { %141 = dma.vmem_to_hbm [thread:$0]  %s136_s15, 32, %s332_s3, [#allocation4], %s255_s23, %s255_s23, %s256_s24  }
 0x11d   :  { %252 = dma.done.wait [#allocation4], 128  }
 0x11e   :  { %253 = vsyncadd [#allocation4], 4294967168 }
 0x11f   :  { %145 = vsyncpa [#allocation3], 1 }
 0x120   :  { %146 = vsyncpa [#allocation6], 1 }
 0x121   :  { %147 = vsyncpa [#allocation4], 1 }

// kernel: tpu_custom_call.1
= control target key start
LH: loop header
LB: loop body
LE: loop exit
PB: predicated region body
PF: predicated region fallthrough
CT: control target
= control target key end

     0   :  { %8 = vsyncpa [#allocation3], 0  ;;  %s329_s0 = inlined_call_operand.hbm [shape: f32[2,32], index: 0, kind: input, shape index: {}]   ;;  %s330_s1 = inlined_call_operand.hbm [shape: f32[32,128], index: 1, kind: input, shape index: {}]   ;;  %s331_s2 = inlined_call_operand.vmem [shape: f32[1,128], index: 2, kind: input, shape index: {}]   ;;  %s332_s3 = inlined_call_operand.hbm [shape: f32[2,128], index: 3, kind: output, shape index: {}]  }
   0x1   :  { %9 = vsyncpa [#allocation6], 0 }
   0x2   :  { %10 = vsyncpa [#allocation4], 0 }
   0x3   :  { %15 = vsyncadd [#allocation3], 96  ;;  %s254_s12 = smov [#allocation2]   ;;  %s182_s16 = scalar_lea.hbm %s329_s0, 32 }
   0x4   :  { %s16_s13 = sshll.u32 %s254_s12, 4  ;;  %p183_p0 = scmp.ne.s32.totalorder %s329_s0, %s182_s16  ;;  %s17_s13 = int_to_ptr.vmem [resolvable:$true] %s16_s13 }
   0x5   :  { %p186_p1 = scmp.lt.u32.totalorder %s182_s16, %s329_s0 }
   0x7   :  { %p188_p2 = pnand %p186_p1, %p183_p0 }
   0x9   :  { %191 = shalt.err (!%p188_p2)
}
   0xa   :  { %s192_s21 = scalar_lea.vmem %s17_s13, 32  ;;  %s196_s22 = scalar_lea.vmem %s17_s13, 128 }
   0xb   :  { %p193_p3 = scmp.ne.s32.totalorder %s17_s13, %s192_s21  ;;  %p197_p4 = scmp.lt.s32.totalorder %s17_s13, %s17_s13 }
   0xc   :  { %p198_p5 = scmp.lt.s32.totalorder %s196_s22, %s192_s21 }
   0xe   :  { %p199_p6 = por %p198_p5, %p197_p4 }
  0x10   :  { %p200_p7 = pnand %p199_p6, %p193_p3 }
  0x12   :  { %203 = shalt.err (!%p200_p7)
}
  0x13   :  { %s255_s23 = smov 32   ;;  %s256_s24 = smov 2  }
  0x14   :  { %22 = dma.hbm_to_vmem [thread:$0]  %s329_s0, 32, %s17_s13, [#allocation3], %s255_s23, %s255_s23, %s256_s24  }
  0x15   :  { %s257_s27 = smov [#allocation5]   ;;  %s204_s4 = scalar_lea.hbm %s330_s1, 512 }
  0x16   :  { %s28_s28 = sshll.u32 %s257_s27, 4  ;;  %p205_p8 = scmp.ne.s32.totalorder %s330_s1, %s204_s4  ;;  %s29_s28 = int_to_ptr.vmem [resolvable:$true] %s28_s28 }
  0x17   :  { %p208_p9 = scmp.lt.u32.totalorder %s204_s4, %s330_s1 }
  0x19   :  { %p210_p10 = pnand %p208_p9, %p205_p8 }
  0x1b   :  { %213 = shalt.err (!%p210_p10)
}
  0x1c   :  { %s214_s9 = scalar_lea.vmem %s29_s28, 512  ;;  %p219_p12 = scmp.lt.s32.totalorder %s29_s28, %s29_s28 }
  0x1d   :  { %p215_p11 = scmp.ne.s32.totalorder %s29_s28, %s214_s9  ;;  %p220_p13 = scmp.lt.s32.totalorder %s214_s9, %s214_s9 }
  0x1f   :  { %p221_p0 = por %p220_p13, %p219_p12 }
  0x21   :  { %p222_p1 = pnand %p221_p0, %p215_p11 }
  0x23   :  { %225 = shalt.err (!%p222_p1)
}
  0x24   :  { %s258_s0 = smov 128   ;;  %s259_s10 = smov 8  }
  0x25   :  { %34 = dma.hbm_to_vmem [thread:$0]  %s330_s1, 512, %s29_s28, [#allocation6], %s258_s0, %s258_s0, %s259_s10  }
  0x26   :  { %248 = dma.done.wait [#allocation3], 128  }
  0x27   :  { %249 = vsyncadd [#allocation3], 4294967168 }
  0x28   :  { %250 = dma.done.wait [#allocation6], 512  }
  0x29   :  { %251 = vsyncadd [#allocation6], 4294966784  ;;  %v260_v0 = vmov 0.0|0.0   ;;  %vm261_vm0 = vmmov 0   ;;  %v262_v1 = vmov 0.0   ;;  %v44_v2 = vld [vmem:[#allocation5] sm:$0xff] }
  0x2a   :  { %166 = vmatprep.subr.bf16.mxu0 %v260_v0  ;;  %163 = vmatprep.mubr.msk.f32.mxu0 %vm261_vm0, %v262_v1  ;;  %v45_v3 = vld [vmem:[#allocation5 + $0x8] sm:$0xff]  ;;  %v46_v4 = vld [vmem:[#allocation5 + $0x10] sm:$0xff]  ;;  %v47_v6 = vld [vmem:[#allocation5 + $0x18] sm:$0xff]  ;;  %vm55_vm1 = vcmask 261120  }
  0x2b   :  { %v167_v5 = vpack.c.bf16 %v45_v3, %v44_v2  ;;  %v170_v7 = vpack.c.bf16 %v47_v6, %v46_v4  ;;  %v43_v8 = vld [vmem:[#allocation2] sm:$0xff] }
  0x2c   :  { %v148_v9 = vld [vmem:[%s331_s2] ss:$0 sm:$0xff] }
  0x2d   :  { %168 = vmatpush3.bf16.msra.mxu0 %v167_v5 }
  0x2e   :  { %169 = vmatprep.subr.bf16.mxu0 %v260_v0 }
  0x31   :  { %171 = vmatpush3.bf16.msra.mxu0 %v170_v7 }
  0x34   :  { %164 = vmatmul.mubr.msk.f32.vlgmr.msra.gmra.mrb[0].mxu0 %vm55_vm1, %v43_v8 }
 0x107   :  { %v125_v10 = vpop.f32.mrb[0].mxu0 }
 0x108   :  { %v126_v11 = vadd.f32 %v148_v9, %v125_v10  ;;  %v165_v12 = vpop.f32.mrb[1].mxu0 }
 0x10a   :  { %129 = vst [vmem:[#allocation7] sm:$0xff] %v126_v11 }
 0x10b   :  { %134 = vsyncadd [#allocation4], 96  ;;  %s263_s14 = smov [#allocation7]  }
 0x10c   :  { %s135_s15 = sshll.u32 %s263_s14, 4  ;;  %s136_s15 = int_to_ptr.vmem [resolvable:$true] %s135_s15 }
 0x10d   :  { %s226_s16 = scalar_lea.vmem %s136_s15, 32  ;;  %s230_s17 = scalar_lea.vmem %s136_s15, 128 }
 0x10e   :  { %p227_p2 = scmp.ne.s32.totalorder %s136_s15, %s226_s16  ;;  %p231_p3 = scmp.lt.s32.totalorder %s136_s15, %s136_s15 }
 0x10f   :  { %p232_p4 = scmp.lt.s32.totalorder %s230_s17, %s226_s16 }
 0x111   :  { %p233_p5 = por %p232_p4, %p231_p3 }
 0x113   :  { %p234_p6 = pnand %p233_p5, %p227_p2 }
 0x115   :  { %237 = shalt.err (!%p234_p6)
}
 0x116   :  { %s238_s2 = scalar_lea.hbm %s332_s3, 32 }
 0x117   :  { %p239_p7 = scmp.ne.s32.totalorder %s332_s3, %s238_s2  ;;  %p242_p8 = scmp.lt.u32.totalorder %s238_s2, %s332_s3 }
 0x119   :  { %p244_p9 = pnand %p242_p8, %p239_p7 }
 0x11b   :  { %247 = shalt.err (!%p244_p9)
}
 0x11c   :  { %141 = dma.vmem_to_hbm [thread:$0]  %s136_s15, 32, %s332_s3, [#allocation4], %s255_s23, %s255_s23, %s256_s24  }
 0x11d   :  { %252 = dma.done.wait [#allocation4], 128  }
 0x11e   :  { %253 = vsyncadd [#allocation4], 4294967168 }
 0x11f   :  { %145 = vsyncpa [#allocation3], 1 }
 0x120   :  { %146 = vsyncpa [#allocation6], 1 }
 0x121   :  { %147 = vsyncpa [#allocation4], 1 }

</bundles_post_ra>
